<compile_context>
chip_gen: v7x
topology: tpu7x:2x2x1
jax: 0.10.0
libtpu: 0.0.40
codegen_flags: <defaults>
</compile_context>

<pallas_src>
import math

import jax
import jax.numpy as jnp
from jax.experimental import pallas as pl
from jax.experimental.pallas import tpu as pltpu


def _round_up(x, m):
    return ((x + m - 1) // m) * m


def _cdiv(a, b):
    return -(-a // b)


# ----------------------------------------------------------------------------
# Kernel factory
# ----------------------------------------------------------------------------
def _make_prior_conti_kernel(layer_kinds):
    """Kernel for the fused (mu || log_var) MLP.

    layer_kinds: per-Linear-layer tag, fixed at trace time.
      "fused": one packed weight (in, out) bf16 + bias (1, out) f32
      "split": separate mu/var hidden weights (H, H) bf16 + fused bias (1, 2H)
    Matmuls run bf16 on the MXU with f32 accumulation; bias add and
    LeakyReLU(0.2) stay f32 on the VPU.
    """
    n_layers = len(layer_kinds)

    def kernel(u_ref, *refs):
        out_ref = refs[-1]
        x = u_ref[...]                              # (TB, dim_u) f32
        idx = 0
        for i, kind in enumerate(layer_kinds):
            if kind == "fused":
                w = refs[idx][...]                  # (in, out) bf16
                b = refs[idx + 1][...]              # (1, out)  f32
                idx += 2
                x = jnp.dot(x.astype(w.dtype), w,
                            preferred_element_type=jnp.float32) + b
            else:  # "split": two lane-aligned 128-wide matmuls (v5x-friendly)
                wm = refs[idx][...]
                wv = refs[idx + 1][...]
                b = refs[idx + 2][...]
                idx += 3
                h_in = wm.shape[0]
                xm = x[:, :h_in].astype(wm.dtype)
                xv = x[:, h_in:].astype(wv.dtype)
                hm = jnp.dot(xm, wm, preferred_element_type=jnp.float32)
                hv = jnp.dot(xv, wv, preferred_element_type=jnp.float32)
                x = jnp.concatenate([hm, hv], axis=1) + b
            if i < n_layers - 1:
                x = jnp.maximum(x, 0.2 * x)         # LeakyReLU(slope=0.2)
        out_ref[...] = x.astype(out_ref.dtype)

    return kernel


# ----------------------------------------------------------------------------
# Chip gating
# ----------------------------------------------------------------------------
def _prefer_fused_hidden():
    """Block-diag hidden fusion fills the 256-wide MXU on v6e/v7x but wastes
    ~2x tiles on v5x's 128x128 MXUs -> un-fuse hidden layers there."""
    try:
        kind = jax.devices()[0].device_kind.lower()
    except Exception:
        return True
    return "v5" not in kind


# ----------------------------------------------------------------------------
# One-time weight packing (hoisted out of the hot path)
# ----------------------------------------------------------------------------
def pack_prior_conti_params(params, *, fuse_hidden=True, lane=128):
    """Fuse mu_net / log_var_net into one packed chain.

    Layer 0      : W = [mu_W0.T | var_W0.T]              (dim_u, 2*H0)
    Hidden i     : fuse_hidden -> blockdiag(mu_Wi.T, var_Wi.T)  (2H, 2H)
                   else        -> (mu_Wi.T, var_Wi.T) kept separate
    Last layer   : blockdiag, output columns zero-padded to a multiple of 128
                   (padding AFTER [mu | var] so [:dim_z]/[dim_z:2*dim_z] holds).
    Weights -> bf16 (MXU operands), biases stay f32.
    """
    mu_net = params["mu_net"]
    var_net = params["log_var_net"]
    n_layers = len(mu_net)
    dim_z = mu_net[-1][0].shape[0]
    out_pad = _round_up(2 * dim_z, lane)

    kinds, arrays = [], []
    for i, ((mw, mb), (vw, vb)) in enumerate(zip(mu_net, var_net)):
        mwt = jnp.asarray(mw, jnp.float32).T     # (in, out)
        vwt = jnp.asarray(vw, jnp.float32).T
        b_cat = jnp.concatenate(
            [jnp.asarray(mb, jnp.float32), jnp.asarray(vb, jnp.float32)]
        ).reshape(1, -1)
        last = (i == n_layers - 1)

        if i == 0:
            w_cat = jnp.concatenate([mwt, vwt], axis=1)          # (dim_u, 2H0)
            kinds.append("fused")
            arrays.append((w_cat.astype(jnp.bfloat16), b_cat))
        elif (not last) and (not fuse_hidden):
            kinds.append("split")
            arrays.append((mwt.astype(jnp.bfloat16),
                           vwt.astype(jnp.bfloat16), b_cat))
        else:
            top = jnp.concatenate(
                [mwt, jnp.zeros((mwt.shape[0], vwt.shape[1]), jnp.float32)],
                axis=1)
            bot = jnp.concatenate(
                [jnp.zeros((vwt.shape[0], mwt.shape[1]), jnp.float32), vwt],
                axis=1)
            w_cat = jnp.concatenate([top, bot], axis=0)           # (2in, 2out)
            if last and w_cat.shape[1] < out_pad:
                pad = out_pad - w_cat.shape[1]
                w_cat = jnp.pad(w_cat, ((0, 0), (0, pad)))
                b_cat = jnp.pad(b_cat, ((0, 0), (0, pad)))
            kinds.append("fused")
            arrays.append((w_cat.astype(jnp.bfloat16), b_cat))

    return {"kinds": tuple(kinds), "arrays": arrays,
            "dim_z": dim_z, "out_pad": out_pad}


# ----------------------------------------------------------------------------
# Forward wrapper
# ----------------------------------------------------------------------------
def prior_conti_forward(u_input, packed, *, max_batch_tile=4096,
                        return_fused=False):
    """Runs the fused Prior_conti forward. Returns (mu, log_var)."""
    u_input = jnp.asarray(u_input, jnp.float32)
    B, dim_u = u_input.shape
    kinds = packed["kinds"]
    arrays = packed["arrays"]
    dim_z = packed["dim_z"]
    out_pad = packed["out_pad"]

    # Batch tiling: aim for >=2 grid steps (v7x megacore sharding via the
    # "parallel" axis) while keeping TB a multiple of 8; weights are resident.
    TB = min(_round_up(max(_cdiv(B, 2), 1), 8), max_batch_tile)
    B_pad = _round_up(B, TB)
    if B_pad != B:
        u_input = jnp.pad(u_input, ((0, B_pad - B), (0, 0)))

    flat = []
    for group in arrays:
        flat.extend(group)

    # u / out stream over the batch grid; packed weights & biases use a
    # constant index_map so they stay VMEM-resident across grid steps.
    in_specs = [pl.BlockSpec((TB, dim_u), lambda i: (i, 0))]
    in_specs += [pl.BlockSpec(a.shape, lambda i: (0, 0)) for a in flat]
    out_spec = pl.BlockSpec((TB, out_pad), lambda i: (i, 0))

    # Advisory cost estimate for XLA's scheduler.
    flops = 0
    bytes_accessed = u_input.size * 4 + B_pad * out_pad * 4
    for kind, group in zip(kinds, arrays):
        if kind == "fused":
            w, b = group
            flops += 2 * B_pad * w.shape[0] * w.shape[1]
            bytes_accessed += w.size * 2 + b.size * 4
        else:
            wm, wv, b = group
            flops += 2 * B_pad * (wm.shape[0] * wm.shape[1]
                                  + wv.shape[0] * wv.shape[1])
            bytes_accessed += (wm.size + wv.size) * 2 + b.size * 4

    out = pl.pallas_call(
        _make_prior_conti_kernel(kinds),
        out_shape=jax.ShapeDtypeStruct((B_pad, out_pad), jnp.float32),
        grid=(B_pad // TB,),
        in_specs=in_specs,
        out_specs=out_spec,
        compiler_params=pltpu.CompilerParams(
            dimension_semantics=("parallel",)),
        cost_estimate=pl.CostEstimate(
            flops=flops, transcendentals=0, bytes_accessed=bytes_accessed),
    )(u_input, *flat)

    if return_fused:
        # TODO(synk): consumers that accept the fused (B_pad, out_pad) slab
        # directly skip 2-3 extra lane-sparse HBM slice copies below.
        return out, dim_z
    return out[:B, :dim_z], out[:B, dim_z:2 * dim_z]


# ----------------------------------------------------------------------------
# Init (mimics nn.Linear default init) and pure-JAX reference
# ----------------------------------------------------------------------------
def init_prior_conti_params(key, dim_z, dim_u, prior_node_list=(128, 128)):
    dims = [dim_u] + list(prior_node_list) + [dim_z]

    def make_net(key):
        net = []
        for i in range(len(dims) - 1):
            fan_in, fan_out = dims[i], dims[i + 1]
            key, kw, kb = jax.random.split(key, 3)
            bound = 1.0 / math.sqrt(fan_in)
            W = jax.random.uniform(kw, (fan_out, fan_in), jnp.float32, -bound, bound)
            b = jax.random.uniform(kb, (fan_out,), jnp.float32, -bound, bound)
            net.append((W, b))
        return net, key

    mu_net, key = make_net(key)
    log_var_net, key = make_net(key)
    return {"mu_net": mu_net, "log_var_net": log_var_net}


def prior_conti_ref(u_input, params):
    """Pure-JAX f32 reference matching the PyTorch forward exactly."""
    def run(net, x):
        for i, (W, b) in enumerate(net):
            x = x @ W.T + b
            if i < len(net) - 1:
                x = jnp.where(x > 0, x, 0.2 * x)
        return x
    return run(params["mu_net"], u_input), run(params["log_var_net"], u_input)


# ----------------------------------------------------------------------------
# Self-test
# ----------------------------------------------------------------------------
if __name__ == "__main__":
    key = jax.random.PRNGKey(0)
    dim_u, dim_z = 32, 16
    prior_node_list = (128, 128)

    key, kp = jax.random.split(key)
    params = init_prior_conti_params(kp, dim_z, dim_u, prior_node_list)

    # One-time packing (not in the hot path); exercise both layouts plus the
    # chip-gated default.
    packings = {
        "auto": pack_prior_conti_params(
            params, fuse_hidden=_prefer_fused_hidden()),
        "fused": pack_prior_conti_params(params, fuse_hidden=True),
        "split": pack_prior_conti_params(params, fuse_hidden=False),
    }

    ok = True
    for name, packed in packings.items():
        for batch in (8, 13):   # 13 exercises batch padding + 2-step grid
            key, ku = jax.random.split(key)
            u_input = jax.random.normal(ku, (batch, dim_u), jnp.float32)

            mu, log_var = prior_conti_forward(u_input, packed)
            jax.block_until_ready((mu, log_var))

            mu_ref, lv_ref = prior_conti_ref(u_input, params)
            ok &= mu.shape == (batch, dim_z) and log_var.shape == (batch, dim_z)
            # bf16 MXU operands -> bf16-level tolerance vs. the f32 reference.
            ok &= bool(jnp.allclose(mu, mu_ref, atol=3e-2, rtol=3e-2))
            ok &= bool(jnp.allclose(log_var, lv_ref, atol=3e-2, rtol=3e-2))

    assert ok
    print("KERNEL_OK")
</pallas_src>

<mosaic_0001>
module attributes {stable_mosaic.version = 11 : i64} {
  func.func @kernel(%arg0: i32, %arg1: memref<8x32xf32, #tpu.memory_space<vmem>>, %arg2: memref<32x256xbf16, #tpu.memory_space<vmem>>, %arg3: memref<1x256xf32, #tpu.memory_space<vmem>>, %arg4: memref<256x256xbf16, #tpu.memory_space<vmem>>, %arg5: memref<1x256xf32, #tpu.memory_space<vmem>>, %arg6: memref<256x128xbf16, #tpu.memory_space<vmem>>, %arg7: memref<1x128xf32, #tpu.memory_space<vmem>>, %arg8: memref<8x128xf32, #tpu.memory_space<vmem>>) attributes {dimension_semantics = [#tpu.dimension_semantics<parallel>], iteration_bounds = array<i64: 1>, scalar_prefetch = 0 : i64, scratch_operands = 0 : i64, tpu.core_type = #tpu.core_type<tc>, window_params = [{transform_indices = @transform_0, window_bounds = array<i64: 8, 32>}, {pipeline_mode = #tpu.pipeline_mode<synchronous>, transform_indices = @transform_1, window_bounds = array<i64: 32, 256>}, {pipeline_mode = #tpu.pipeline_mode<synchronous>, transform_indices = @transform_2, window_bounds = array<i64: 1, 256>}, {pipeline_mode = #tpu.pipeline_mode<synchronous>, transform_indices = @transform_3, window_bounds = array<i64: 256, 256>}, {pipeline_mode = #tpu.pipeline_mode<synchronous>, transform_indices = @transform_4, window_bounds = array<i64: 1, 256>}, {pipeline_mode = #tpu.pipeline_mode<synchronous>, transform_indices = @transform_5, window_bounds = array<i64: 256, 128>}, {pipeline_mode = #tpu.pipeline_mode<synchronous>, transform_indices = @transform_6, window_bounds = array<i64: 1, 128>}, {transform_indices = @transform_7, window_bounds = array<i64: 8, 128>}]} {
    %c0 = arith.constant 0 : index
    %c0_0 = arith.constant 0 : index
    %0 = vector.load %arg1[%c0, %c0_0] : memref<8x32xf32, #tpu.memory_space<vmem>>, vector<8x32xf32>
    %c0_1 = arith.constant 0 : index
    %c0_2 = arith.constant 0 : index
    %1 = vector.load %arg2[%c0_1, %c0_2] : memref<32x256xbf16, #tpu.memory_space<vmem>>, vector<32x256xbf16>
    %c0_3 = arith.constant 0 : index
    %c0_4 = arith.constant 0 : index
    %2 = vector.load %arg3[%c0_3, %c0_4] : memref<1x256xf32, #tpu.memory_space<vmem>>, vector<1x256xf32>
    %3 = arith.truncf %0 : vector<8x32xf32> to vector<8x32xbf16>
    %cst = arith.constant dense<0.000000e+00> : vector<8x256xf32>
    %4 = tpu.matmul %3, %1, %cst {dimension_numbers = #tpu.dot_dimension_numbers<[1], [0], [0], [1], [0, 0, 1, 1], [], []>} : vector<8x32xbf16>, vector<32x256xbf16>, vector<8x256xf32> -> vector<8x256xf32>
    %5 = vector.broadcast %2 : vector<1x256xf32> to vector<8x256xf32>
    %6 = arith.addf %4, %5 : vector<8x256xf32>
    %cst_5 = arith.constant 2.000000e-01 : f32
    %7 = vector.broadcast %cst_5 : f32 to vector<8x256xf32>
    %8 = arith.mulf %7, %6 : vector<8x256xf32>
    %9 = arith.maximumf %6, %8 : vector<8x256xf32>
    %c0_6 = arith.constant 0 : index
    %c0_7 = arith.constant 0 : index
    %10 = vector.load %arg4[%c0_6, %c0_7] : memref<256x256xbf16, #tpu.memory_space<vmem>>, vector<256x256xbf16>
    %c0_8 = arith.constant 0 : index
    %c0_9 = arith.constant 0 : index
    %11 = vector.load %arg5[%c0_8, %c0_9] : memref<1x256xf32, #tpu.memory_space<vmem>>, vector<1x256xf32>
    %12 = arith.truncf %9 : vector<8x256xf32> to vector<8x256xbf16>
    %cst_10 = arith.constant dense<0.000000e+00> : vector<8x256xf32>
    %13 = tpu.matmul %12, %10, %cst_10 {dimension_numbers = #tpu.dot_dimension_numbers<[1], [0], [0], [1], [0, 0, 1, 1], [], []>} : vector<8x256xbf16>, vector<256x256xbf16>, vector<8x256xf32> -> vector<8x256xf32>
    %14 = vector.broadcast %11 : vector<1x256xf32> to vector<8x256xf32>
    %15 = arith.addf %13, %14 : vector<8x256xf32>
    %cst_11 = arith.constant 2.000000e-01 : f32
    %16 = vector.broadcast %cst_11 : f32 to vector<8x256xf32>
    %17 = arith.mulf %16, %15 : vector<8x256xf32>
    %18 = arith.maximumf %15, %17 : vector<8x256xf32>
    %c0_12 = arith.constant 0 : index
    %c0_13 = arith.constant 0 : index
    %19 = vector.load %arg6[%c0_12, %c0_13] : memref<256x128xbf16, #tpu.memory_space<vmem>>, vector<256x128xbf16>
    %c0_14 = arith.constant 0 : index
    %c0_15 = arith.constant 0 : index
    %20 = vector.load %arg7[%c0_14, %c0_15] : memref<1x128xf32, #tpu.memory_space<vmem>>, vector<1x128xf32>
    %21 = arith.truncf %18 : vector<8x256xf32> to vector<8x256xbf16>
    %cst_16 = arith.constant dense<0.000000e+00> : vector<8x128xf32>
    %22 = tpu.matmul %21, %19, %cst_16 {dimension_numbers = #tpu.dot_dimension_numbers<[1], [0], [0], [1], [0, 0, 1, 1], [], []>} : vector<8x256xbf16>, vector<256x128xbf16>, vector<8x128xf32> -> vector<8x128xf32>
    %23 = vector.broadcast %20 : vector<1x128xf32> to vector<8x128xf32>
    %24 = arith.addf %22, %23 : vector<8x128xf32>
    %c0_17 = arith.constant 0 : index
    %c0_18 = arith.constant 0 : index
    %25 = vector.load %arg8[%c0_17, %c0_18] : memref<8x128xf32, #tpu.memory_space<vmem>>, vector<8x128xf32>
    tpu.vector_store %arg8[%c0_17, %c0_18], %24 {strides = array<i32>} : memref<8x128xf32, #tpu.memory_space<vmem>>, vector<8x128xf32>,
    return
  }
  func.func @transform_0(%arg0: i32) -> (i32, i32) {
    %c0_i32 = arith.constant 0 : i32
    %c0_i32_0 = arith.constant 0 : i32
    return %arg0, %c0_i32 : i32, i32
  }
  func.func @transform_1(%arg0: i32) -> (i32, i32) {
    %c0_i32 = arith.constant 0 : i32
    %c0_i32_0 = arith.constant 0 : i32
    %c0_i32_1 = arith.constant 0 : i32
    return %c0_i32, %c0_i32_0 : i32, i32
  }
  func.func @transform_2(%arg0: i32) -> (i32, i32) {
    %c0_i32 = arith.constant 0 : i32
    %c0_i32_0 = arith.constant 0 : i32
    %c0_i32_1 = arith.constant 0 : i32
    return %c0_i32, %c0_i32_0 : i32, i32
  }
  func.func @transform_3(%arg0: i32) -> (i32, i32) {
    %c0_i32 = arith.constant 0 : i32
    %c0_i32_0 = arith.constant 0 : i32
    %c0_i32_1 = arith.constant 0 : i32
    return %c0_i32, %c0_i32_0 : i32, i32
  }
  func.func @transform_4(%arg0: i32) -> (i32, i32) {
    %c0_i32 = arith.constant 0 : i32
    %c0_i32_0 = arith.constant 0 : i32
    %c0_i32_1 = arith.constant 0 : i32
    return %c0_i32, %c0_i32_0 : i32, i32
  }
  func.func @transform_5(%arg0: i32) -> (i32, i32) {
    %c0_i32 = arith.constant 0 : i32
    %c0_i32_0 = arith.constant 0 : i32
    %c0_i32_1 = arith.constant 0 : i32
    return %c0_i32, %c0_i32_0 : i32, i32
  }
  func.func @transform_6(%arg0: i32) -> (i32, i32) {
    %c0_i32 = arith.constant 0 : i32
    %c0_i32_0 = arith.constant 0 : i32
    %c0_i32_1 = arith.constant 0 : i32
    return %c0_i32, %c0_i32_0 : i32, i32
  }
  func.func @transform_7(%arg0: i32) -> (i32, i32) {
    %c0_i32 = arith.constant 0 : i32
    %c0_i32_0 = arith.constant 0 : i32
    return %arg0, %c0_i32 : i32, i32
  }
}

</mosaic_0001>

<bundles_post_ra>
// kernel: tpu_custom_call.1
= control target key start
LH: loop header
LB: loop body
LE: loop exit
PB: predicated region body
PF: predicated region fallthrough
CT: control target
= control target key end

     0   :  { %12 = vsyncpa [#allocation3], 0  ;;  %s1013_s0 = inlined_call_operand.hbm [shape: f32[8,32], index: 0, kind: input, shape index: {}]   ;;  %s1014_s1 = inlined_call_operand.hbm [shape: bf16[32,256], index: 1, kind: input, shape index: {}]   ;;  %s1015_s2 = inlined_call_operand.vmem [shape: f32[1,256], index: 2, kind: input, shape index: {}]   ;;  %s1016_s3 = inlined_call_operand.hbm [shape: bf16[256,256], index: 3, kind: input, shape index: {}]   ;;  %s1017_s4 = inlined_call_operand.vmem [shape: f32[1,256], index: 4, kind: input, shape index: {}]   ;;  %s1018_s5 = inlined_call_operand.hbm [shape: bf16[256,128], index: 5, kind: input, shape index: {}]   ;;  %s1019_s6 = inlined_call_operand.vmem [shape: f32[1,128], index: 6, kind: input, shape index: {}]   ;;  %s1020_s7 = inlined_call_operand.hbm [shape: f32[8,128], index: 7, kind: output, shape index: {}]  }
   0x1   :  { %13 = vsyncpa [#allocation6], 0 }
   0x2   :  { %14 = vsyncpa [#allocation9], 0 }
   0x3   :  { %15 = vsyncpa [#allocation4], 0  ;;  %s888_s24 = smov [#allocation5]   ;;  %s770_s28 = scalar_lea.hbm %s1014_s1, 512 }
   0x4   :  { %s31_s25 = sshll.u32 %s888_s24, 4  ;;  %p771_p0 = scmp.ne.s32.totalorder %s1014_s1, %s770_s28  ;;  %s32_s25 = int_to_ptr.vmem [resolvable:$true] %s31_s25 }
   0x5   :  { %p774_p1 = scmp.lt.u32.totalorder %s770_s28, %s1014_s1 }
   0x7   :  { %p776_p2 = pnand %p774_p1, %p771_p0 }
   0x9   :  { %779 = shalt.err (!%p776_p2)
}
   0xa   :  { %s780_s10 = scalar_lea.vmem %s32_s25, 512  ;;  %p785_p4 = scmp.lt.s32.totalorder %s32_s25, %s32_s25 }
   0xb   :  { %p781_p3 = scmp.ne.s32.totalorder %s32_s25, %s780_s10  ;;  %p786_p5 = scmp.lt.s32.totalorder %s780_s10, %s780_s10 }
   0xd   :  { %p787_p6 = por %p786_p5, %p785_p4 }
   0xf   :  { %p788_p7 = pnand %p787_p6, %p781_p3 }
  0x11   :  { %791 = shalt.err (!%p788_p7)
}
  0x12   :  { %s889_s11 = smov 128   ;;  %s890_s12 = smov 8  }
  0x13   :  { %37 = dma.hbm_to_vmem [thread:$0]  %s1014_s1, 512, %s32_s25, [#allocation6], %s889_s11, %s889_s11, %s890_s12  }
  0x14   :  { %s891_s15 = smov [#allocation2]   ;;  %s892_s17 = smov [#allocation7]  }
  0x15   :  { %s22_s16 = sshll.u32 %s891_s15, 4  ;;  %s45_s18 = sshll.u32 %s892_s17, 4  ;;  %s23_s16 = int_to_ptr.vmem [resolvable:$true] %s22_s16  ;;  %s46_s18 = int_to_ptr.vmem [resolvable:$true] %s45_s18 }
  0x16   :  { %s792_s21 = scalar_lea.hbm %s1013_s0, 128 }
  0x17   :  { %p793_p8 = scmp.ne.s32.totalorder %s1013_s0, %s792_s21  ;;  %p796_p9 = scmp.lt.u32.totalorder %s792_s21, %s1013_s0 }
  0x19   :  { %p798_p10 = pnand %p796_p9, %p793_p8 }
  0x1b   :  { %801 = shalt.err (!%p798_p10)
}
  0x1c   :  { %s802_s1 = scalar_lea.vmem %s23_s16, 128  ;;  %p807_p12 = scmp.lt.s32.totalorder %s23_s16, %s23_s16 }
  0x1d   :  { %p803_p11 = scmp.ne.s32.totalorder %s23_s16, %s802_s1  ;;  %p808_p13 = scmp.lt.s32.totalorder %s802_s1, %s802_s1 }
  0x1f   :  { %p809_p0 = por %p808_p13, %p807_p12 }
  0x21   :  { %p810_p1 = pnand %p809_p0, %p803_p11 }
  0x23   :  { %813 = shalt.err (!%p810_p1)
}
  0x24   :  { %25 = dma.hbm_to_vmem [thread:$0]  %s1013_s0, 128, %s23_s16, [#allocation3]  }
  0x25   :  { %s814_s30 = scalar_lea.hbm %s1016_s3, 4096 }
  0x26   :  { %p815_p2 = scmp.ne.s32.totalorder %s1016_s3, %s814_s30  ;;  %p818_p3 = scmp.lt.u32.totalorder %s814_s30, %s1016_s3 }
  0x28   :  { %p820_p4 = pnand %p818_p3, %p815_p2 }
  0x2a   :  { %823 = shalt.err (!%p820_p4)
}
  0x2b   :  { %s824_s14 = scalar_lea.vmem %s46_s18, 4096  ;;  %p829_p6 = scmp.lt.s32.totalorder %s46_s18, %s46_s18 }
  0x2c   :  { %p825_p5 = scmp.ne.s32.totalorder %s46_s18, %s824_s14  ;;  %p830_p7 = scmp.lt.s32.totalorder %s824_s14, %s824_s14 }
  0x2e   :  { %p831_p8 = por %p830_p7, %p829_p6 }
  0x30   :  { %p832_p9 = pnand %p831_p8, %p825_p5 }
  0x32   :  { %835 = shalt.err (!%p832_p9)
}
  0x33   :  { %51 = dma.hbm_to_vmem [thread:$0]  %s1016_s3, 4096, %s46_s18, [#allocation6], %s889_s11, %s889_s11, %s890_s12  }
  0x34   :  { %s893_s16 = smov [#allocation8]   ;;  %s836_s21 = scalar_lea.hbm %s1018_s5, 2048 }
  0x35   :  { %s59_s17 = sshll.u32 %s893_s16, 4  ;;  %p837_p10 = scmp.ne.s32.totalorder %s1018_s5, %s836_s21  ;;  %s60_s17 = int_to_ptr.vmem [resolvable:$true] %s59_s17 }
  0x36   :  { %p840_p11 = scmp.lt.u32.totalorder %s836_s21, %s1018_s5 }
  0x38   :  { %p842_p12 = pnand %p840_p11, %p837_p10 }
  0x3a   :  { %845 = shalt.err (!%p842_p12)
}
  0x3b   :  { %s846_s1 = scalar_lea.vmem %s60_s17, 2048  ;;  %p851_p0 = scmp.lt.s32.totalorder %s60_s17, %s60_s17 }
  0x3c   :  { %p847_p13 = scmp.ne.s32.totalorder %s60_s17, %s846_s1  ;;  %p852_p1 = scmp.lt.s32.totalorder %s846_s1, %s846_s1 }
  0x3e   :  { %p853_p2 = por %p852_p1, %p851_p0 }
  0x40   :  { %p854_p3 = pnand %p853_p2, %p847_p13 }
  0x42   :  { %857 = shalt.err (!%p854_p3)
}
  0x43   :  { %s894_s3 = smov 64   ;;  %s895_s11 = smov 4  }
  0x44   :  { %65 = dma.hbm_to_vmem [thread:$0]  %s1018_s5, 2048, %s60_s17, [#allocation9], %s894_s3, %s894_s3, %s895_s11  }
  0x45   :  { %880 = dma.done.wait [#allocation3], 128  }
  0x46   :  { %881 = vsyncadd [#allocation3], 4294967168 }
  0x47   :  { %882 = dma.done.wait [#allocation6], 4608  }
  0x48   :  { %883 = vsyncadd [#allocation6], 4294962688 }
  0x49   :  { %884 = dma.done.wait [#allocation9], 2048  }
  0x4a   :  { %885 = vsyncadd [#allocation9], 4294965248  ;;  %v896_v0 = vmov 0   ;;  %v700_v1 = vld [vmem:[#allocation5 + $0x4] ss:$8 sps:$4 sm:$0xff]   ;;  %v81_v5 = vld [vmem:[#allocation2] sm:$0xff]  ;;  %v89_v50 = vlaneseq }
  0x4b   :  { %155 = vmatprep.mubr.bf16.mxu0 %v896_v0  ;;  %v702_v2 = vld [vmem:[#allocation5] ss:$8 sps:$4 sm:$0xff]   ;;  %123 = vmatprep.subr.bf16.mxu0 %v700_v1  ;;  %v703_v3 = vld [vmem:[#allocation5 + $0x14] ss:$8 sps:$4 sm:$0xff]   ;;  %v705_v4 = vld [vmem:[#allocation5 + $0x10] ss:$8 sps:$4 sm:$0xff]   ;;  %v87_v9 = vpack.c.bf16 %v81_v5, %v81_v5 }
  0x4c   :  { %124 = vmatpush1.bf16.msra.mxu0 %v702_v2  ;;  %v706_v6 = vld [vmem:[#allocation7 + $0x4] ss:$8 sps:$4 sm:$0xff]   ;;  %v708_v7 = vld [vmem:[#allocation7] ss:$8 sps:$4 sm:$0xff]   ;;  %v709_v8 = vld [vmem:[#allocation7 + $0x14] ss:$8 sps:$4 sm:$0xff]  }
  0x4d   :  { %125 = vmatprep.subr.bf16.mxu0 %v703_v3  ;;  %374 = vmatprep.subr.bf16.mxu1 %v706_v6  ;;  %v711_v10 = vld [vmem:[#allocation7 + $0x10] ss:$8 sps:$4 sm:$0xff]   ;;  %vm119_vm0 = vcmask 261120   ;;  %v712_v11 = vld [vmem:[#allocation7 + $0x24] ss:$8 sps:$4 sm:$0xff]   ;;  %v90_v51 = vshrl.u32 %v89_v50, 7 }
  0x4e   :  { %375 = vmatpush1.bf16.msra.mxu1 %v708_v7  ;;  %v714_v12 = vld [vmem:[#allocation7 + $0x20] ss:$8 sps:$4 sm:$0xff]   ;;  %v715_v13 = vld [vmem:[#allocation7 + $0x34] ss:$8 sps:$4 sm:$0xff]   ;;  %v717_v14 = vld [vmem:[#allocation7 + $0x30] ss:$8 sps:$4 sm:$0xff]  }
  0x4f   :  { %376 = vmatprep.subr.bf16.mxu1 %v709_v8  ;;  %v718_v15 = vld [vmem:[#allocation7 + $0x44] ss:$8 sps:$4 sm:$0xff]   ;;  %v720_v16 = vld [vmem:[#allocation7 + $0x40] ss:$8 sps:$4 sm:$0xff]   ;;  %v721_v17 = vld [vmem:[#allocation7 + $0x54] ss:$8 sps:$4 sm:$0xff]  }
  0x50   :  { %126 = vmatpush1.bf16.msra.mxu0 %v705_v4  ;;  %v723_v18 = vld [vmem:[#allocation7 + $0x50] ss:$8 sps:$4 sm:$0xff]   ;;  %v724_v19 = vld [vmem:[#allocation7 + $0x64] ss:$8 sps:$4 sm:$0xff]   ;;  %v726_v20 = vld [vmem:[#allocation7 + $0x60] ss:$8 sps:$4 sm:$0xff]  }
  0x51   :  { %v727_v21 = vld [vmem:[#allocation7 + $0x74] ss:$8 sps:$4 sm:$0xff]   ;;  %v729_v22 = vld [vmem:[#allocation7 + $0x70] ss:$8 sps:$4 sm:$0xff]   ;;  %v730_v23 = vld [vmem:[#allocation7 + $0x84] ss:$8 sps:$4 sm:$0xff]  }
  0x52   :  { %377 = vmatpush1.bf16.msra.mxu1 %v711_v10  ;;  %v732_v24 = vld [vmem:[#allocation7 + $0x80] ss:$8 sps:$4 sm:$0xff]   ;;  %v733_v25 = vld [vmem:[#allocation7 + $0x94] ss:$8 sps:$4 sm:$0xff]   ;;  %v735_v26 = vld [vmem:[#allocation7 + $0x90] ss:$8 sps:$4 sm:$0xff]  }
  0x53   :  { %618 = vmatmul.mubr.msk.bf16.vlgmr.msra.gmra.mrb[0].mxu0 %vm119_vm0, %v87_v9  ;;  %378 = vmatprep.subr.bf16.mxu1 %v712_v11  ;;  %v736_v27 = vld [vmem:[#allocation7 + $0xa4] ss:$8 sps:$4 sm:$0xff]   ;;  %v738_v28 = vld [vmem:[#allocation7 + $0xa0] ss:$8 sps:$4 sm:$0xff]   ;;  %v739_v29 = vld [vmem:[#allocation7 + $0xb4] ss:$8 sps:$4 sm:$0xff]  }
  0x54   :  { %v741_v30 = vld [vmem:[#allocation7 + $0xb0] ss:$8 sps:$4 sm:$0xff]   ;;  %v742_v31 = vld [vmem:[#allocation7 + $0xc4] ss:$8 sps:$4 sm:$0xff]   ;;  %v744_v32 = vld [vmem:[#allocation7 + $0xc0] ss:$8 sps:$4 sm:$0xff]  }
  0x55   :  { %v745_v33 = vld [vmem:[#allocation7 + $0xd4] ss:$8 sps:$4 sm:$0xff]   ;;  %v747_v34 = vld [vmem:[#allocation7 + $0xd0] ss:$8 sps:$4 sm:$0xff]   ;;  %v748_v35 = vld [vmem:[#allocation7 + $0xe4] ss:$8 sps:$4 sm:$0xff]  }
  0x56   :  { %379 = vmatpush1.bf16.msra.mxu1 %v714_v12  ;;  %v750_v36 = vld [vmem:[#allocation7 + $0xe0] ss:$8 sps:$4 sm:$0xff]   ;;  %v751_v37 = vld [vmem:[#allocation7 + $0xf4] ss:$8 sps:$4 sm:$0xff]   ;;  %v753_v38 = vld [vmem:[#allocation7 + $0xf0] ss:$8 sps:$4 sm:$0xff]  }
  0x57   :  { %380 = vmatprep.subr.bf16.mxu1 %v715_v13  ;;  %v754_v39 = vld [vmem:[#allocation8 + $0x40] sm:$0xff]   ;;  %v756_v41 = vld [vmem:[#allocation8 + $0x48] sm:$0xff]   ;;  %v758_v43 = vld [vmem:[#allocation8 + $0x50] sm:$0xff]   ;;  %v91_v52 = vsub.s32 0, %v90_v51  ;;  %v95_v54 = vsub.s32 1, %v90_v51 }
  0x58   :  { %v755_v40 = vld [vmem:[#allocation8] sm:$0xff]   ;;  %668 = vmatprep.subr.bf16.mxu0 %v754_v39  ;;  %v757_v42 = vld [vmem:[#allocation8 + $0x8] sm:$0xff]   ;;  %v759_v44 = vld [vmem:[#allocation8 + $0x10] sm:$0xff]  }
  0x59   :  { %669 = vmatpush3.bf16.msra.mxu0 %v755_v40  ;;  %v760_v45 = vld [vmem:[#allocation8 + $0x58] sm:$0xff]   ;;  %v762_v47 = vld [vmem:[#allocation8 + $0x60] sm:$0xff]   ;;  %v764_v49 = vld [vmem:[#allocation8 + $0x68] sm:$0xff]  }
  0x5a   :  { %381 = vmatpush1.bf16.msra.mxu1 %v717_v14  ;;  %670 = vmatprep.subr.bf16.mxu0 %v756_v41  ;;  %v761_v46 = vld [vmem:[#allocation8 + $0x18] sm:$0xff]   ;;  %v763_v48 = vld [vmem:[#allocation8 + $0x20] sm:$0xff]   ;;  %v765_v5 = vld [vmem:[#allocation8 + $0x28] sm:$0xff]  }
  0x5b   :  { %382 = vmatprep.subr.bf16.mxu1 %v718_v15  ;;  %v86_v53 = vld [vmem:[%s1015_s2] sm:$0x3]  ;;  %v766_v6 = vld [vmem:[#allocation8 + $0x70] sm:$0xff]  }
  0x5c   :  { %v92_v55 = vrot.slane %v86_v53, %v91_v52  ;;  %v96_v56 = vrot.slane %v86_v53, %v95_v54  ;;  %v767_v7 = vld [vmem:[#allocation8 + $0x30] sm:$0xff]   ;;  %v768_v8 = vld [vmem:[#allocation8 + $0x78] sm:$0xff]  }
  0x5d   :  { %671 = vmatpush3.bf16.msra.mxu0 %v757_v42  ;;  %v769_v9 = vld [vmem:[#allocation8 + $0x38] sm:$0xff]  }
  0x5e   :  { %383 = vmatpush1.bf16.msra.mxu1 %v720_v16  ;;  %672 = vmatprep.subr.bf16.mxu0 %v758_v43  ;;  %v200_v10 = vld [vmem:[%s1017_s4] sm:$0x3]  ;;  %s897_s4 = smov [#allocation10]  }
  0x5f   :  { %384 = vmatprep.subr.bf16.mxu1 %v721_v17  ;;  %v207_v11 = vrot.slane %v200_v10, %v91_v52  ;;  %v211_v12 = vrot.slane %v200_v10, %v95_v54  ;;  %s603_s30 = sshll.u32 %s897_s4, 4  ;;  %s604_s30 = int_to_ptr.vmem [resolvable:$true] %s603_s30 }
  0x60   :  { %s858_s8 = scalar_lea.vmem %s604_s30, 128  ;;  %p863_p5 = scmp.lt.s32.totalorder %s604_s30, %s604_s30 }
  0x61   :  { %673 = vmatpush3.bf16.msra.mxu0 %v759_v44  ;;  %p859_p4 = scmp.ne.s32.totalorder %s604_s30, %s858_s8  ;;  %p864_p6 = scmp.lt.s32.totalorder %s858_s8, %s858_s8 }
  0x62   :  { %385 = vmatpush1.bf16.msra.mxu1 %v723_v18  ;;  %674 = vmatprep.subr.bf16.mxu0 %v760_v45 }
  0x63   :  { %386 = vmatprep.subr.bf16.mxu1 %v724_v19  ;;  %p865_p7 = por %p864_p6, %p863_p5 }
  0x65   :  { %675 = vmatpush3.bf16.msra.mxu0 %v761_v46  ;;  %p866_p8 = pnand %p865_p7, %p859_p4 }
  0x66   :  { %387 = vmatpush1.bf16.msra.mxu1 %v726_v20  ;;  %676 = vmatprep.subr.bf16.mxu0 %v762_v47 }
  0x67   :  { %388 = vmatprep.subr.bf16.mxu1 %v727_v21 }
  0x69   :  { %677 = vmatpush3.bf16.msra.mxu0 %v763_v48 }
  0x6a   :  { %389 = vmatpush1.bf16.msra.mxu1 %v729_v22  ;;  %678 = vmatprep.subr.bf16.mxu0 %v764_v49 }
  0x6b   :  { %390 = vmatprep.subr.bf16.mxu1 %v730_v23 }
  0x6d   :  { %679 = vmatpush3.bf16.msra.mxu0 %v765_v5 }
  0x6e   :  { %391 = vmatpush1.bf16.msra.mxu1 %v732_v24  ;;  %680 = vmatprep.subr.bf16.mxu0 %v766_v6 }
  0x6f   :  { %392 = vmatprep.subr.bf16.mxu1 %v733_v25 }
  0x71   :  { %681 = vmatpush3.bf16.msra.mxu0 %v767_v7 }
  0x72   :  { %393 = vmatpush1.bf16.msra.mxu1 %v735_v26  ;;  %682 = vmatprep.subr.bf16.mxu0 %v768_v8  ;;  %v651_v26 = vld [vmem:[%s1019_s6] ss:$0 sm:$0xff] }
  0x73   :  { %394 = vmatprep.subr.bf16.mxu1 %v736_v27 }
  0x75   :  { %683 = vmatpush3.bf16.msra.mxu0 %v769_v9 }
  0x76   :  { %395 = vmatpush1.bf16.msra.mxu1 %v738_v28 }
  0x77   :  { %396 = vmatprep.subr.bf16.mxu1 %v739_v29 }
  0x7a   :  { %397 = vmatpush1.bf16.msra.mxu1 %v741_v30 }
  0x7b   :  { %398 = vmatprep.subr.bf16.mxu1 %v742_v31 }
  0x7e   :  { %399 = vmatpush1.bf16.msra.mxu1 %v744_v32 }
  0x7f   :  { %400 = vmatprep.subr.bf16.mxu1 %v745_v33 }
  0x82   :  { %401 = vmatpush1.bf16.msra.mxu1 %v747_v34 }
  0x83   :  { %402 = vmatprep.subr.bf16.mxu1 %v748_v35 }
  0x86   :  { %403 = vmatpush1.bf16.msra.mxu1 %v750_v36 }
  0x87   :  { %404 = vmatprep.subr.bf16.mxu1 %v751_v37 }
  0x8a   :  { %405 = vmatpush1.bf16.msra.mxu1 %v753_v38 }
 0x126   :  { %v157_v57 = vpop.f32.mrb[0].mxu0 }
 0x127   :  { %v158_v58 = vadd.f32 %v157_v57, %v92_v55  ;;  %v159_v59 = vpop.f32.mrb[1].mxu0 }
 0x128   :  { %v160_v60 = vadd.f32 %v159_v59, %v96_v56  ;;  %v161_v61 = vpop.f32.mrb[2].mxu0 }
 0x129   :  { %v164_v62 = vmul.f32 0.2, %v158_v58  ;;  %v162_v63 = vpop.f32.mrb[3].mxu0 }
 0x12a   :  { %v165_v0 = vmul.f32 0.2, %v160_v60 }
 0x12b   :  { %v166_v1 = vmax.f32 %v158_v58, %v164_v62 }
 0x12c   :  { %v167_v2 = vmax.f32 %v160_v60, %v165_v0 }
 0x12d   :  { %v201_v4 = vpack.c.bf16 %v166_v1, %v166_v1 }
 0x12e   :  { %v202_v3 = vpack.c.bf16 %v167_v2, %v167_v2 }
 0x130   :  { %406 = vmatprep.mubr.bf16.mxu1 %v202_v3 }
 0x131   :  { %407 = vmatmul.mubr.bf16.vlgmr.msra.gmra.mrb[0].mxu1 %v201_v4 }
 0x204   :  { %v408_v13 = vpop.f32.mrb[0].mxu1 }
 0x205   :  { %v409_v14 = vadd.f32 %v408_v13, %v207_v11  ;;  %v410_v15 = vpop.f32.mrb[1].mxu1 }
 0x206   :  { %v411_v16 = vadd.f32 %v410_v15, %v211_v12  ;;  %v412_v17 = vpop.f32.mrb[2].mxu1 }
 0x207   :  { %v415_v18 = vmul.f32 0.2, %v409_v14  ;;  %v413_v19 = vpop.f32.mrb[3].mxu1 }
 0x208   :  { %v416_v20 = vmul.f32 0.2, %v411_v16 }
 0x209   :  { %v417_v21 = vmax.f32 %v409_v14, %v415_v18 }
 0x20a   :  { %v418_v22 = vmax.f32 %v411_v16, %v416_v20 }
 0x20b   :  { %v452_v24 = vpack.c.bf16 %v417_v21, %v417_v21 }
 0x20c   :  { %v453_v23 = vpack.c.bf16 %v418_v22, %v418_v22 }
 0x20e   :  { %588 = vmatprep.mubr.bf16.mxu0 %v453_v23 }
 0x20f   :  { %589 = vmatmul.mubr.bf16.vlgmr.msra.gmra.mrb[4].mxu0 %v452_v24 }
 0x2e2   :  { %v684_v25 = vpop.f32.mrb[4].mxu0 }
 0x2e3   :  { %v685_v27 = vpop.f32.mrb[5].mxu0 }
 0x2e4   :  { %v686_v28 = vadd.f32 %v685_v27, %v684_v25  ;;  %v687_v29 = vpop.f32.mrb[6].mxu0 }
 0x2e5   :  { %v688_v30 = vpop.f32.mrb[7].mxu0 }
 0x2e6   :  { %v591_v31 = vadd.f32 %v686_v28, %v651_v26 }
 0x2e8   :  { %596 = vst [vmem:[#allocation10] sm:$0xff] %v591_v31 }
 0x2e9   :  { %869 = shalt.err (!%p866_p8)
}
 0x2ea   :  { %s870_s6 = scalar_lea.hbm %s1020_s7, 128 }
 0x2eb   :  { %p871_p9 = scmp.ne.s32.totalorder %s1020_s7, %s870_s6  ;;  %p874_p10 = scmp.lt.u32.totalorder %s870_s6, %s1020_s7 }
 0x2ed   :  { %p876_p11 = pnand %p874_p10, %p871_p9 }
 0x2ef   :  { %879 = shalt.err (!%p876_p11)
}
 0x2f0   :  { %606 = dma.vmem_to_hbm [thread:$0]  %s604_s30, 128, %s1020_s7, [#allocation4]  }
 0x2f1   :  { %886 = dma.done.wait [#allocation4], 128  }
 0x2f2   :  { %887 = vsyncadd [#allocation4], 4294967168 }
 0x2f3   :  { %610 = vsyncpa [#allocation3], 1 }
 0x2f4   :  { %611 = vsyncpa [#allocation6], 1 }
 0x2f5   :  { %612 = vsyncpa [#allocation9], 1 }
 0x2f6   :  { %613 = vsyncpa [#allocation4], 1 }

</bundles_post_ra>
